<compile_context>
chip_gen: v7x
topology: tpu7x:2x2x1
jax: 0.10.0
libtpu: 0.0.40
codegen_flags: <defaults>
</compile_context>

<pallas_src>
import math
from functools import partial

import jax
import jax.numpy as jnp
from jax.experimental import pallas as pl
from jax.experimental.pallas import tpu as pltpu


def _build_pe(d_model: int, max_len: int = 5000) -> jnp.ndarray:
    """Deterministic sinusoidal table, identical to the PyTorch __init__."""
    pos = jnp.arange(max_len, dtype=jnp.float32)[:, None]                 # (max_len, 1)
    div = jnp.exp(jnp.arange(0, d_model, 2, dtype=jnp.float32)
                  * (-math.log(10000.0) / d_model))                       # (d_model//2,)
    pe = jnp.zeros((max_len, d_model), dtype=jnp.float32)
    pe = pe.at[:, 0::2].set(jnp.sin(pos * div))
    pe = pe.at[:, 1::2].set(jnp.cos(pos * div))
    return pe                                                             # (max_len, d_model)


def _add_pe_kernel(x_ref, pe_ref, o_ref):
    # x_ref / o_ref: (tR, L) block of one batch row (batch dim squeezed by BlockSpec).
    # pe_ref:        (tR, L) matching slice of the positional table (cast rides a free VPU slot).
    o_ref[...] = x_ref[...] + pe_ref[...].astype(x_ref.dtype)


def _tile_config():
    """(target_tile_bytes, vmem_limit_bytes) per TPU generation."""
    try:
        kind = jax.devices()[0].device_kind.lower()
    except Exception:
        kind = ""
    if "v5" in kind:
        # v5e: ~820 GB/s HBM, 16 MiB scoped-VMEM default -> 2 MiB tiles, default limit.
        return 2 * 1024 * 1024, None
    # v6e / v7x: faster HBM; bigger tiles amortize per-step overhead.
    # 6 double-buffered 4 MiB tiles = 24 MiB, comfortably under a 48 MiB scoped limit
    # (v7x physical VMEM is 64 MiB).
    return 4 * 1024 * 1024, 48 * 1024 * 1024


def _choose_row_tile(R: int, L: int, x_itemsize: int, pe_itemsize: int,
                     target_bytes: int) -> int:
    """Largest (8-multiple) row tile whose (tR, L) block stays <= target_bytes."""
    bytes_per_row = L * max(x_itemsize, pe_itemsize)
    max_rows = max(1, target_bytes // bytes_per_row)
    if R <= max_rows:
        return R                          # whole row axis fits in one block
    return max(8, (max_rows // 8) * 8)    # (8,128)-aligned; cdiv grid masks the ragged tail


@partial(jax.jit, static_argnames=("donate_x",))
def positional_encoding_forward(x: jnp.ndarray, pe_full: jnp.ndarray, *,
                                donate_x: bool = False) -> jnp.ndarray:
    """x: (B, S, D). Returns x + pe[:S] broadcast over batch."""
    B, S, D = x.shape
    pe = pe_full[:S, :]                   # stored dtype; cast happens inside the kernel

    # --- lane-dense 2-D view of the trailing (S, D) dims ------------------------------
    if D % 128 == 0:
        R, L, pad = S, D, 0
        x2, pe2 = x, pe
    else:
        N = S * D
        L = 128
        R = pl.cdiv(N, L)
        pad = R * L - N
        x_flat = x.reshape(B, N)
        pe_flat = pe.reshape(N)
        if pad:
            x_flat = jnp.pad(x_flat, ((0, 0), (0, pad)))
            pe_flat = jnp.pad(pe_flat, ((0, pad),))
        x2 = x_flat.reshape(B, R, L)
        pe2 = pe_flat.reshape(R, L)

    target_bytes, vmem_limit = _tile_config()
    tR = _choose_row_tile(R, L, jnp.dtype(x.dtype).itemsize,
                          jnp.dtype(pe2.dtype).itemsize, target_bytes)
    num_r = pl.cdiv(R, tR)

    # --- grid: keep the pe block index constant across consecutive steps --------------
    if num_r >= 2:
        # batch innermost -> pe tile is NOT re-DMA'd per batch (copy elided).
        grid = (num_r, B)
        x_map = lambda r, b: (b, r, 0)
        pe_map = lambda r, b: (r, 0)
    else:
        # Row axis collapsed to one block: put batch outermost so megacore (v7x) still has
        # >= 2 parallel blocks; pe block index is constant (0, 0), fetched once.
        grid = (B, num_r)
        x_map = lambda b, r: (b, r, 0)
        pe_map = lambda b, r: (r, 0)

    cp_kwargs = dict(dimension_semantics=("parallel", "parallel"))
    if vmem_limit is not None:
        cp_kwargs["vmem_limit_bytes"] = vmem_limit

    call_kwargs = {}
    if donate_x:
        # Only valid when the caller donates x's buffer (otherwise XLA inserts a copy).
        call_kwargs["input_output_aliases"] = {0: 0}

    out = pl.pallas_call(
        _add_pe_kernel,
        out_shape=jax.ShapeDtypeStruct((B, R, L), x.dtype),
        grid_spec=pltpu.PrefetchScalarGridSpec(
            num_scalar_prefetch=0,
            grid=grid,
            in_specs=[
                pl.BlockSpec((None, tR, L), x_map),   # batch dim squeezed from kernel view
                pl.BlockSpec((tR, L), pe_map),        # broadcast over batch via index_map
            ],
            out_specs=pl.BlockSpec((None, tR, L), x_map),
        ),
        compiler_params=pltpu.CompilerParams(**cp_kwargs),
        **call_kwargs,
    )(x2, pe2)

    # TODO(synk): in production, fuse this add into the neighboring kernel (epilogue/prologue)
    # to save one full read+write of the activation tensor.
    if D % 128 == 0:
        return out
    if pad:
        return out.reshape(B, R * L)[:, :S * D].reshape(B, S, D)
    return out.reshape(B, S, D)


if __name__ == "__main__":
    B, S, D = 2, 8, 32
    key = jax.random.PRNGKey(0)
    x = jax.random.normal(key, (B, S, D), dtype=jnp.float32)

    pe_full = _build_pe(d_model=D, max_len=5000)

    out = positional_encoding_forward(x, pe_full)
    out = jax.block_until_ready(out)

    # reference check (pure JAX)
    ref = x + pe_full[None, :S, :]
    assert out.shape == (B, S, D)
    assert out.dtype == x.dtype
    assert jnp.allclose(out, ref, atol=1e-6), "mismatch vs reference"

    print("KERNEL_OK")
</pallas_src>

<mosaic_0001>
module attributes {stable_mosaic.version = 11 : i64} {
  func.func @_add_pe_kernel(%arg0: i32, %arg1: i32, %arg2: memref<1x2x128xf32, #tpu.memory_space<vmem>>, %arg3: memref<2x128xf32, #tpu.memory_space<vmem>>, %arg4: memref<1x2x128xf32, #tpu.memory_space<vmem>>) attributes {dimension_semantics = [#tpu.dimension_semantics<parallel>, #tpu.dimension_semantics<parallel>], iteration_bounds = array<i64: 2, 1>, scalar_prefetch = 0 : i64, scratch_operands = 0 : i64, tpu.core_type = #tpu.core_type<tc>, window_params = [{transform_indices = @transform_0, window_bounds = array<i64: 1, 2, 128>}, {transform_indices = @transform_1, window_bounds = array<i64: 2, 128>}, {transform_indices = @transform_2, window_bounds = array<i64: 1, 2, 128>}]} {
    %c0 = arith.constant 0 : index
    %c0_0 = arith.constant 0 : index
    %c0_1 = arith.constant 0 : index
    %0 = vector.load %arg2[%c0, %c0_0, %c0_1] : memref<1x2x128xf32, #tpu.memory_space<vmem>>, vector<1x2x128xf32>
    %1 = vector.shape_cast %0 : vector<1x2x128xf32> to vector<2x128xf32>
    %c0_2 = arith.constant 0 : index
    %c0_3 = arith.constant 0 : index
    %2 = vector.load %arg3[%c0_2, %c0_3] : memref<2x128xf32, #tpu.memory_space<vmem>>, vector<2x128xf32>
    %3 = arith.addf %1, %2 : vector<2x128xf32>
    %c0_4 = arith.constant 0 : index
    %c0_5 = arith.constant 0 : index
    %c0_6 = arith.constant 0 : index
    %4 = vector.load %arg4[%c0_4, %c0_5, %c0_6] : memref<1x2x128xf32, #tpu.memory_space<vmem>>, vector<1x2x128xf32>
    %5 = vector.shape_cast %4 : vector<1x2x128xf32> to vector<2x128xf32>
    %6 = vector.shape_cast %3 : vector<2x128xf32> to vector<1x2x128xf32>
    tpu.vector_store %arg4[%c0_4, %c0_5, %c0_6], %6 {strides = array<i32>} : memref<1x2x128xf32, #tpu.memory_space<vmem>>, vector<1x2x128xf32>,
    return
  }
  func.func @transform_0(%arg0: i32, %arg1: i32) -> (i32, i32, i32) {
    %c0_i32 = arith.constant 0 : i32
    %c0_i32_0 = arith.constant 0 : i32
    return %arg0, %arg1, %c0_i32 : i32, i32, i32
  }
  func.func @transform_1(%arg0: i32, %arg1: i32) -> (i32, i32) {
    %c0_i32 = arith.constant 0 : i32
    %c0_i32_0 = arith.constant 0 : i32
    return %arg1, %c0_i32 : i32, i32
  }
  func.func @transform_2(%arg0: i32, %arg1: i32) -> (i32, i32, i32) {
    %c0_i32 = arith.constant 0 : i32
    %c0_i32_0 = arith.constant 0 : i32
    return %arg0, %arg1, %c0_i32 : i32, i32, i32
  }
}

</mosaic_0001>

<bundles_post_ra>
// kernel: positional_encoding_forward.1
= control target key start
LH: loop header
LB: loop body
LE: loop exit
PB: predicated region body
PF: predicated region fallthrough
CT: control target
= control target key end

     0   :  { %s354_s9 = smov 0   ;;  %s331_s10 = smov 0   ;;  %s368_s0 = inlined_call_operand.vmem [shape: f32[2,2,128], index: 0, kind: input, shape index: {}]   ;;  %s369_s1 = inlined_call_operand.vmem [shape: f32[2,128], index: 1, kind: input, shape index: {}]   ;;  %s370_s2 = inlined_call_operand.vmem [shape: f32[2,2,128], index: 2, kind: output, shape index: {}]  }
   0x1   :  { %s335_s11 = smov 0  }
   0x2 LB: > { %s24_s12 = sadd.s32 1, %s333_s10  ;;  %p286_p0 = scmp.ge.s32.totalorder %s337_s11, 1  ;;  %s337_s11 = sphi %s335_s11, %s12_s11   ;;  %s333_s10 = sphi %s331_s10, %s332_s10   ;;  %s329_s9 = sphi %s354_s9, %s371_s9  }
   0x3   : > { %p26_p1 = scmp.ge.s32.totalorder %s24_s12, 2  ;;  %p139_p2 = scmp.lt.s32.totalorder %s337_s11, 3 }
   0x5   : > { %s373_s12 = smov (%p26_p1, %s24_s12), 0  ;;  %p140_p3 = pnand %p286_p0, %p139_p2 }
   0x6   : > { %p169_p4 = scmp.lt.s32.totalorder (!%p140_p3), %s329_s9, 1  ;;  %v188_v0 = vld [vmem:[%s369_s1] sm:$0x3] (!%p140_p3) }
   0x7   : > { %143 = sbr.rel (%p140_p3) target bundleno = 21 (0x15), region = 28 }
   0xe   : > { %s375_s9 = smov (!%p169_p4, %s329_s9), 1 }
   0xf   : > { %s287_s13 = sshll.u32 %s375_s9, 1 }
  0x10   : > { %s175_s18 = scalar_lea.vmem %s368_s0, %s287_s13  ;;  %s186_s21 = scalar_lea.vmem %s370_s2, %s287_s13 }
  0x11   : > { %v187_v1 = vld [vmem:[%s175_s18] sm:$0x3] }
  0x12   : > { %v189_v2 = vadd.f32 %v188_v0, %v187_v1 }
  0x14   : > { %190 = vst [vmem:[%s186_s21] sm:$0x3] %v189_v2 }
  0x15 PF: > { %s12_s11 = sadd.s32 1, %s337_s11   ;;  %s371_s9 = smov %s333_s10 }
  0x16   : > { %p9_p5 = scmp.ge.s32.totalorder %s12_s11, 4   ;;  %s332_s10 = smov %s373_s12  }
  0x18   :  { %11 = sbr.rel (!%p9_p5) target bundleno = 2 (0x2), region = 61 }

</bundles_post_ra>
